<compile_context>
chip_gen: v7x
topology: tpu7x:2x2x1
jax: 0.10.0
libtpu: 0.0.40
codegen_flags: <defaults>
</compile_context>

<pallas_src>
import jax
import jax.numpy as jnp
from jax.experimental import pallas as pl
from jax.experimental.pallas import tpu as pltpu


def _global_module_kernel(seed_ref, feat_ref, orig_ref, wg_ref, wcur_ref,
                          out_ref):
    """One grid step == one batch element, native (C, L) layout.

    seed_ref : (S, Nseed)       seed features for this batch element
    feat_ref : (P, Np)          proposal features
    orig_ref : (P, Np)          features to be gated
    wg_ref   : (P, S + P + 1)   packed [w_seed | w_gfeat | bias]
    wcur_ref : (P, P)           per-position conv weight
    out_ref  : (P, Np)
    """
    feat = feat_ref[...]

    # F.max_pool1d(x, kernel_size=L): one XLU reduce over the lane axis each.
    g1 = jnp.max(seed_ref[...], axis=-1, keepdims=True)            # (S, 1)
    g2 = jnp.max(feat, axis=-1, keepdims=True)                     # (P, 1)
    one = jnp.ones((1, 1), dtype=wg_ref.dtype)
    xg = jnp.concatenate(
        [g1.astype(wg_ref.dtype), g2.astype(wg_ref.dtype), one],
        axis=0)                                                    # (S+P+1, 1)

    # Position-independent half of the Conv1d (bias folded in): one matvec.
    vec = jnp.dot(wg_ref[...], xg,
                  preferred_element_type=jnp.float32)              # (P, 1)

    # Position-dependent half: (P, P) @ (P, Np) on the MXU, f32 accumulation.
    conv = jnp.dot(wcur_ref[...], feat.astype(wcur_ref.dtype),
                   preferred_element_type=jnp.float32) + vec       # (P, Np)

    # torch.sigmoid(torch.log(torch.abs(x))) == |x| / (1 + |x|)  (exact).
    a = jnp.abs(conv)
    gate = a / (1.0 + a)
    # Reference gives gate=1 when conv overflows to +/-inf; a/(1+a) would NaN.
    gate = jnp.where(jnp.isinf(a), jnp.float32(1.0), gate)

    out_ref[...] = (orig_ref[...].astype(jnp.float32) * gate).astype(out_ref.dtype)


def pack_global_conv_params(weight, bias, seed_feature_dim, proposal_feature_dim):
    """One-time (init-time) packing of the Conv1d(kernel_size=1) parameters.

    weight: (P, S + 2P) squeezed conv weight; bias: (P,).
    Returns (w_g, w_cur): bias is folded into the "global" half so the
    position-independent part of the conv is a single matvec in the kernel.
    """
    S, P = seed_feature_dim, proposal_feature_dim
    w_g = jnp.concatenate(
        [weight[:, :S + P], bias.reshape(P, 1).astype(weight.dtype)], axis=1)
    w_cur = weight[:, S + P:]
    return w_g, w_cur


@jax.jit
def global_module_forward(seed_features, features, origin_features, w_g, w_cur):
    """seed_features: (B, S, Nseed); features / origin_features: (B, P, Np)."""
    B, S, Nseed = seed_features.shape
    _, P, Np = features.shape
    assert origin_features.shape == features.shape
    assert w_g.shape == (P, S + P + 1)
    assert w_cur.shape == (P, P)

    return pl.pallas_call(
        _global_module_kernel,
        out_shape=jax.ShapeDtypeStruct((B, P, Np), origin_features.dtype),
        grid=(B,),
        in_specs=[
            pl.BlockSpec((None, S, Nseed), lambda b: (b, 0, 0)),
            pl.BlockSpec((None, P, Np), lambda b: (b, 0, 0)),
            pl.BlockSpec((None, P, Np), lambda b: (b, 0, 0)),
            pl.BlockSpec((P, S + P + 1), lambda b: (0, 0)),
            pl.BlockSpec((P, P), lambda b: (0, 0)),
        ],
        out_specs=pl.BlockSpec((None, P, Np), lambda b: (b, 0, 0)),
        compiler_params=pltpu.CompilerParams(
            dimension_semantics=("parallel",)),
    )(seed_features, features, origin_features, w_g, w_cur)


def _reference(seed_features, features, origin_features, weight, bias):
    """Pure-JAX replica of the PyTorch forward (for verification)."""
    g1 = jnp.max(seed_features, axis=2, keepdims=True)
    g2 = jnp.max(features, axis=2, keepdims=True)
    g = jnp.concatenate([g1, g2], axis=1)
    g = jnp.broadcast_to(g, (features.shape[0], g.shape[1], features.shape[2]))
    g = jnp.concatenate([g, features], axis=1)
    conv = jnp.einsum("oc,bcn->bon", weight, g) + bias[None, :, None]
    gate = jax.nn.sigmoid(jnp.log(jnp.abs(conv)))
    return origin_features * gate


if __name__ == "__main__":
    # Small shapes consistent with the module's forward:
    #   seed_features   : (B, seed_feature_dim, num_seeds)
    #   features        : (B, proposal_feature_dim, num_proposals)
    #   origin_features : (B, proposal_feature_dim, num_proposals)
    B = 2
    seed_feature_dim = 32
    proposal_feature_dim = 16
    num_proposals = 128
    num_seeds = 64

    key = jax.random.PRNGKey(0)
    k_seed, k_feat, k_orig, k_w, k_b = jax.random.split(key, 5)

    seed_features = jax.random.normal(
        k_seed, (B, seed_feature_dim, num_seeds), dtype=jnp.float32)
    features = jax.random.normal(
        k_feat, (B, proposal_feature_dim, num_proposals), dtype=jnp.float32)
    origin_features = jax.random.normal(
        k_orig, (B, proposal_feature_dim, num_proposals), dtype=jnp.float32)

    # Conv1d(seed_dim + 2*prop_dim, prop_dim, 1): weight (P, Cin, 1) -> (P, Cin)
    c_in = seed_feature_dim + 2 * proposal_feature_dim
    bound = 1.0 / (c_in ** 0.5)   # PyTorch default init range
    weight = jax.random.uniform(
        k_w, (proposal_feature_dim, c_in), jnp.float32, -bound, bound)
    bias = jax.random.uniform(
        k_b, (proposal_feature_dim,), jnp.float32, -bound, bound)

    # "Init-time" weight packing, hoisted out of the forward path.
    w_g, w_cur = pack_global_conv_params(
        weight, bias, seed_feature_dim, proposal_feature_dim)

    out = global_module_forward(seed_features, features, origin_features,
                                w_g, w_cur)
    out = jax.block_until_ready(out)

    ref = _reference(seed_features, features, origin_features, weight, bias)
    assert out.shape == ref.shape == (B, proposal_feature_dim, num_proposals)
    # Exact-reciprocal gate -> tight tolerance (only f32 matmul rounding left).
    assert jnp.allclose(out, ref, atol=1e-4, rtol=1e-4)

    print("KERNEL_OK")
</pallas_src>

<mosaic_0001>
module attributes {stable_mosaic.version = 11 : i64} {
  func.func @_global_module_kernel(%arg0: i32, %arg1: memref<1x32x64xf32, #tpu.memory_space<vmem>>, %arg2: memref<1x16x128xf32, #tpu.memory_space<vmem>>, %arg3: memref<1x16x128xf32, #tpu.memory_space<vmem>>, %arg4: memref<16x49xf32, #tpu.memory_space<vmem>>, %arg5: memref<16x16xf32, #tpu.memory_space<vmem>>, %arg6: memref<1x16x128xf32, #tpu.memory_space<vmem>>) attributes {dimension_semantics = [#tpu.dimension_semantics<parallel>], iteration_bounds = array<i64: 2>, scalar_prefetch = 0 : i64, scratch_operands = 0 : i64, tpu.core_type = #tpu.core_type<tc>, window_params = [{transform_indices = @transform_0, window_bounds = array<i64: 1, 32, 64>}, {transform_indices = @transform_1, window_bounds = array<i64: 1, 16, 128>}, {transform_indices = @transform_2, window_bounds = array<i64: 1, 16, 128>}, {pipeline_mode = #tpu.pipeline_mode<synchronous>, transform_indices = @transform_3, window_bounds = array<i64: 16, 49>}, {pipeline_mode = #tpu.pipeline_mode<synchronous>, transform_indices = @transform_4, window_bounds = array<i64: 16, 16>}, {transform_indices = @transform_5, window_bounds = array<i64: 1, 16, 128>}]} {
    %c0 = arith.constant 0 : index
    %c0_0 = arith.constant 0 : index
    %c0_1 = arith.constant 0 : index
    %0 = vector.load %arg2[%c0, %c0_0, %c0_1] : memref<1x16x128xf32, #tpu.memory_space<vmem>>, vector<1x16x128xf32>
    %1 = vector.shape_cast %0 : vector<1x16x128xf32> to vector<16x128xf32>
    %c0_2 = arith.constant 0 : index
    %c0_3 = arith.constant 0 : index
    %c0_4 = arith.constant 0 : index
    %2 = vector.load %arg1[%c0_2, %c0_3, %c0_4] : memref<1x32x64xf32, #tpu.memory_space<vmem>>, vector<1x32x64xf32>
    %3 = vector.shape_cast %2 : vector<1x32x64xf32> to vector<32x64xf32>
    %cst = arith.constant dense<0xFF800000> : vector<32xf32>
    %4 = vector.multi_reduction <maximumf>, %3, %cst [1] : vector<32x64xf32> to vector<32xf32>
    %5 = vector.shape_cast %4 : vector<32xf32> to vector<32x1xf32>
    %cst_5 = arith.constant dense<0xFF800000> : vector<16xf32>
    %6 = vector.multi_reduction <maximumf>, %1, %cst_5 [1] : vector<16x128xf32> to vector<16xf32>
    %7 = vector.shape_cast %6 : vector<16xf32> to vector<16x1xf32>
    %cst_6 = arith.constant 1.000000e+00 : f32
    %8 = vector.broadcast %cst_6 : f32 to vector<1x1xf32>
    %9 = tpu.concatenate %5, %7, %8 in 0 : vector<32x1xf32>, vector<16x1xf32>, vector<1x1xf32> -> vector<49x1xf32>
    %c0_7 = arith.constant 0 : index
    %c0_8 = arith.constant 0 : index
    %10 = vector.load %arg4[%c0_7, %c0_8] : memref<16x49xf32, #tpu.memory_space<vmem>>, vector<16x49xf32>
    %cst_9 = arith.constant dense<0.000000e+00> : vector<16x1xf32>
    %11 = tpu.matmul %10, %9, %cst_9 {dimension_numbers = #tpu.dot_dimension_numbers<[1], [0], [0], [1], [0, 0, 1, 1], [], []>} : vector<16x49xf32>, vector<49x1xf32>, vector<16x1xf32> -> vector<16x1xf32>
    %c0_10 = arith.constant 0 : index
    %c0_11 = arith.constant 0 : index
    %12 = vector.load %arg5[%c0_10, %c0_11] : memref<16x16xf32, #tpu.memory_space<vmem>>, vector<16x16xf32>
    %cst_12 = arith.constant dense<0.000000e+00> : vector<16x128xf32>
    %13 = tpu.matmul %12, %1, %cst_12 {dimension_numbers = #tpu.dot_dimension_numbers<[1], [0], [0], [1], [0, 0, 1, 1], [], []>} : vector<16x16xf32>, vector<16x128xf32>, vector<16x128xf32> -> vector<16x128xf32>
    %14 = vector.broadcast %11 : vector<16x1xf32> to vector<16x128xf32>
    %15 = arith.addf %13, %14 : vector<16x128xf32>
    %16 = math.absf %15 : vector<16x128xf32>
    %cst_13 = arith.constant 1.000000e+00 : f32
    %17 = vector.broadcast %cst_13 : f32 to vector<16x128xf32>
    %18 = arith.addf %17, %16 : vector<16x128xf32>
    %19 = arith.divf %16, %18 : vector<16x128xf32>
    %20 = math.absf %16 : vector<16x128xf32>
    %cst_14 = arith.constant 0x7F800000 : f32
    %21 = vector.broadcast %cst_14 : f32 to vector<16x128xf32>
    %22 = arith.cmpf oeq, %20, %21 : vector<16x128xf32>
    %cst_15 = arith.constant 1.000000e+00 : f32
    %23 = vector.broadcast %cst_15 : f32 to vector<16x128xf32>
    %24 = arith.select %22, %23, %19 : vector<16x128xi1>, vector<16x128xf32>
    %c0_16 = arith.constant 0 : index
    %c0_17 = arith.constant 0 : index
    %c0_18 = arith.constant 0 : index
    %25 = vector.load %arg3[%c0_16, %c0_17, %c0_18] : memref<1x16x128xf32, #tpu.memory_space<vmem>>, vector<1x16x128xf32>
    %26 = vector.shape_cast %25 : vector<1x16x128xf32> to vector<16x128xf32>
    %27 = arith.mulf %26, %24 : vector<16x128xf32>
    %c0_19 = arith.constant 0 : index
    %c0_20 = arith.constant 0 : index
    %c0_21 = arith.constant 0 : index
    %28 = vector.load %arg6[%c0_19, %c0_20, %c0_21] : memref<1x16x128xf32, #tpu.memory_space<vmem>>, vector<1x16x128xf32>
    %29 = vector.shape_cast %28 : vector<1x16x128xf32> to vector<16x128xf32>
    %30 = vector.shape_cast %27 : vector<16x128xf32> to vector<1x16x128xf32>
    tpu.vector_store %arg6[%c0_19, %c0_20, %c0_21], %30 {strides = array<i32>} : memref<1x16x128xf32, #tpu.memory_space<vmem>>, vector<1x16x128xf32>,
    return
  }
  func.func @transform_0(%arg0: i32) -> (i32, i32, i32) {
    %c0_i32 = arith.constant 0 : i32
    %c0_i32_0 = arith.constant 0 : i32
    %c0_i32_1 = arith.constant 0 : i32
    return %arg0, %c0_i32, %c0_i32_0 : i32, i32, i32
  }
  func.func @transform_1(%arg0: i32) -> (i32, i32, i32) {
    %c0_i32 = arith.constant 0 : i32
    %c0_i32_0 = arith.constant 0 : i32
    %c0_i32_1 = arith.constant 0 : i32
    return %arg0, %c0_i32, %c0_i32_0 : i32, i32, i32
  }
  func.func @transform_2(%arg0: i32) -> (i32, i32, i32) {
    %c0_i32 = arith.constant 0 : i32
    %c0_i32_0 = arith.constant 0 : i32
    %c0_i32_1 = arith.constant 0 : i32
    return %arg0, %c0_i32, %c0_i32_0 : i32, i32, i32
  }
  func.func @transform_3(%arg0: i32) -> (i32, i32) {
    %c0_i32 = arith.constant 0 : i32
    %c0_i32_0 = arith.constant 0 : i32
    %c0_i32_1 = arith.constant 0 : i32
    return %c0_i32, %c0_i32_0 : i32, i32
  }
  func.func @transform_4(%arg0: i32) -> (i32, i32) {
    %c0_i32 = arith.constant 0 : i32
    %c0_i32_0 = arith.constant 0 : i32
    %c0_i32_1 = arith.constant 0 : i32
    return %c0_i32, %c0_i32_0 : i32, i32
  }
  func.func @transform_5(%arg0: i32) -> (i32, i32, i32) {
    %c0_i32 = arith.constant 0 : i32
    %c0_i32_0 = arith.constant 0 : i32
    %c0_i32_1 = arith.constant 0 : i32
    return %arg0, %c0_i32, %c0_i32_0 : i32, i32, i32
  }
}

</mosaic_0001>

<bundles_post_ra>
// kernel: global_module_forward.1
= control target key start
LH: loop header
LB: loop body
LE: loop exit
PB: predicated region body
PF: predicated region fallthrough
CT: control target
= control target key end

     0   :  { %s1498_s0 = inlined_call_operand.hbm [shape: f32[2,32,64], index: 0, kind: input, shape index: {}]   ;;  %s1499_s1 = inlined_call_operand.hbm [shape: f32[2,16,128], index: 1, kind: input, shape index: {}]   ;;  %s1500_s2 = inlined_call_operand.hbm [shape: f32[2,16,128], index: 2, kind: input, shape index: {}]   ;;  %s1501_s3 = inlined_call_operand.hbm [shape: f32[16,49], index: 3, kind: input, shape index: {}]   ;;  %s1502_s4 = inlined_call_operand.hbm [shape: f32[16,16], index: 4, kind: input, shape index: {}]   ;;  %s1503_s5 = inlined_call_operand.hbm [shape: f32[2,16,128], index: 5, kind: output, shape index: {}]  }
   0x1   :  { %1525 = sst [smem:[#allocation21_spill]] %s1499_s1 }
   0x2   :  { %1526 = sst [smem:[#allocation22_spill]] %s1501_s3 }
   0x3   :  { %1527 = sst [smem:[#allocation23_spill]] %s1503_s5 }
   0x4   :  { %10 = vsyncpa [#allocation3], 0 }
   0x5   :  { %12 = vsyncpa [#allocation3 + $0x1], 0 }
   0x6   :  { %13 = vsyncpa [#allocation6], 0 }
   0x7   :  { %15 = vsyncpa [#allocation6 + $0x1], 0 }
   0x8   :  { %16 = vsyncpa [#allocation9], 0 }
   0x9   :  { %17 = vsyncpa [#allocation4], 0 }
   0xa   :  { %19 = vsyncpa [#allocation4 + $0x1], 0  ;;  %s1164_s18 = smov 0   ;;  %s1166_s19 = smov 0  }
   0xb   :  { %s1168_s20 = smov 0   ;;  %s1170_s21 = smov 0  }
   0xc LB: > { %1528 = sst [smem:[#allocation16_spill]] %s1108_s18  ;;  %s1185_s22 = sadd.s32 4294967295, %s1120_s21   ;;  %s1120_s21 = sphi %s1170_s21, %s1563_s21   ;;  %s1116_s20 = sphi %s1168_s20, %s1565_s20   ;;  %s1112_s19 = sphi %s1166_s19, %s1567_s19   ;;  %s1108_s18 = sphi %s1164_s18, %s1566_s18  }
   0xd   : > { %1529 = sst [smem:[#allocation17_spill]] %s1116_s20  ;;  %s723_s23 = sadd.s32 4294967294, %s1120_s21  }
   0xe   : > { %s1189_s24 = sadd.s32 1, %s1120_s21   ;;  %s32_s25 = sadd.s32 1, %s1116_s20 }
   0xf   : > { %1530 = sst [smem:[#allocation18_spill]] %s1189_s24  ;;  %s29_s26 = ssub.s32 %s1120_s21, %s1189_s24 }
  0x10   : > { %p39_p0 = scmp.ne.s32.totalorder %s1116_s20, %s1112_s19  ;;  %p30_p1 = scmp.eq.s32.totalorder %s29_s26, 0 }
  0x11   : > { %p40_p2 = scmp.eq.s32.totalorder %s1120_s21, 0  ;;  %p45_p3 = scmp.ne.s32.totalorder %s1112_s19, %s1108_s18 }
  0x12   : > { %p1504_p4 = scmp.eq.s32.totalorder %s1185_s22, 0  ;;  %p163_p7 = scmp.eq.s32.totalorder %s1185_s22, 1 }
  0x13   : > { %s1201_s27 = scalar_select %p30_p1, %s1116_s20, %s32_s25  }
  0x14   : > { %p1203_p5 = por %p40_p2, %p39_p0  ;;  %p1209_p6 = por %p1504_p4, %p45_p3 }
  0x15   : > { %1531 = sst [smem:[#allocation19_spill]] %s1201_s27  ;;  %p169_p8 = scmp.eq.s32.totalorder %s723_s23, 1 }
  0x16   : > { %s1532_s28 = scalar_select %p1203_p5, 1, 0 }
  0x17   : > { %s1533_s29 = scalar_select %p1209_p6, 1, 0 }
  0x18   : > { %p724_p9 = scmp.ge.s32.totalorder %s1120_s21, 1  ;;  %p176_p10 = scmp.lt.s32.totalorder %s1120_s21, 3 }
  0x19   : > { %p1216_p11 = por %p163_p7, %p39_p0  ;;  %p1220_p12 = por %p169_p8, %p45_p3 }
  0x1a   : > { %p1224_p13 = pnand %p724_p9, %p176_p10  ;;  %s1122_s8 = smov [#allocation8]  }
  0x1b   : > { %s1534_s30 = scalar_select %p1216_p11, 1, 0 }
  0x1c   : > { %s1535_s6 = scalar_select %p1220_p12, 1, 0 }
  0x1d   : > { %s1537_s7 = scalar_select %p1224_p13, 1, 0 }
  0x1e   : > { %1536 = sst [smem:[#allocation20_spill]] %s1535_s6  ;;  %p827_p1 = pneg %p1224_p13 }
  0x1f   : > { %s188_s9 = sshll.u32 %s1122_s8, 4  ;;  %s1239_s11 = sand.u32 1, %s1116_s20   ;;  %s189_s9 = int_to_ptr.vmem [resolvable:$true] %s188_s9 }
  0x20   : > { %p1232_p2 = pnand %p827_p1, %p1504_p4  ;;  %s236_s12 = sand.u32 1, %s1120_s21  }
  0x21   : > { %s1539_s3 = sld [smem:[#allocation22_spill]] }
  0x22   : > { %s1538_s10 = scalar_select %p1232_p2, 1, 0 }
  0x23   : > { %p1512_p8 = pneg %p1232_p2 }
  0x27   : > { %s900_s15 = scalar_lea.hbm %s1539_s3, 256 }
  0x28   : > { %p901_p7 = scmp.ne.s32.totalorder %s1539_s3, %s900_s15  ;;  %p907_p1 = scmp.lt.u32.totalorder %s900_s15, %s1539_s3 }
  0x2a   : > { %p903_p9 = pnand %p1512_p8, %p901_p7 }
  0x2c   : > { %p904_p10 = pneg %p903_p9 }
  0x2e   : > { %p909_p0 = pnand %p907_p1, %p904_p10 }
  0x30   : > { %912 = shalt.err (!%p909_p0)
}
  0x31   : > { %s913_s26 = scalar_lea.vmem %s189_s9, 256  ;;  %p921_p11 = scmp.lt.s32.totalorder %s189_s9, %s189_s9 }
  0x32   : > { %p914_p4 = scmp.ne.s32.totalorder %s189_s9, %s913_s26  ;;  %p922_p6 = scmp.lt.s32.totalorder %s913_s26, %s913_s26 }
  0x34   : > { %p916_p3 = pnand %p914_p4, %p1512_p8  ;;  %p923_p13 = por %p922_p6, %p921_p11 }
  0x36   : > { %p917_p12 = pneg %p916_p3 }
  0x38   : > { %p924_p5 = pnand %p923_p13, %p917_p12 }
  0x3a   : > { %927 = shalt.err (!%p924_p5)
}
  0x3b   : > { %s1508_s8 = smov 128   ;;  %s1124_s13 = smov 8  }
  0x3c   : > { %830 = dma.hbm_to_vmem [thread:$0]  (!%p1232_p2), %s1539_s3, 256, %s189_s9, [#allocation9], %s1508_s8, %s1508_s8, %s1124_s13  }
  0x3d   : > { %p1540_p4 = scmp.ne.s32.totalorder %s1532_s28, 0  ;;  %p1541_p6 = scmp.lt.s32.totalorder %s1120_s21, 2 }
  0x3e   : > { %s1510_s17 = sshll.u32 %s1239_s11, 4  ;;  %s1511_s23 = sshll.u32 %s1120_s21, 8 }
  0x3f   : > { %p1271_p5 = pnand %p1541_p6, %p1540_p4  ;;  %s1543_s1 = sld [smem:[#allocation21_spill]] }
  0x40   : > { %s240_s28 = scalar_lea.vmem [#allocation5], %s1510_s17  ;;  %s1288_s14 = scalar_lea.sflag [#allocation6], %s236_s12 }
  0x41   : > { %s1542_s16 = scalar_select %p1271_p5, 1, 0 }
  0x42   : > { %s247_s9 = sshll.u32 %s240_s28, 4  ;;  %p1294_p12 = pneg %p1271_p5  ;;  %s1286_s9 = int_to_ptr.vmem [resolvable:$true] %s247_s9 }
  0x44   : > { %s1544_s8 = scalar_select %p1294_p12, 1, 0 }
  0x45   : > { %s1282_s27 = scalar_lea.hbm %s1543_s1, %s1511_s23  ;;  %s933_s17 = scalar_lea.hbm %s1543_s1, 512 }
  0x46   : > { %s928_s15 = scalar_lea.hbm %s1282_s27, 256  ;;  %p934_p3 = scmp.lt.u32.totalorder %s1282_s27, %s1543_s1 }
  0x47   : > { %p929_p11 = scmp.ne.s32.totalorder %s1282_s27, %s928_s15  ;;  %p935_p7 = scmp.lt.u32.totalorder %s933_s17, %s928_s15 }
  0x48   : > { %p937_p10 = scmp.lt.u32.totalorder %s928_s15, %s1282_s27 }
  0x49   : > { %p931_p13 = pnand %p1294_p12, %p929_p11  ;;  %p936_p9 = por %p935_p7, %p934_p3 }
  0x4b   : > { %p932_p0 = pneg %p931_p13  ;;  %p938_p1 = por %p937_p10, %p936_p9 }
  0x4d   : > { %p939_p4 = pnand %p938_p1, %p932_p0 }
  0x4f   : > { %942 = shalt.err (!%p939_p4)
}
  0x50   : > { %s943_s12 = scalar_lea.vmem %s1286_s9, 256  ;;  %s1125_s25 = smov [#allocation5]  }
  0x51   : > { %p944_p6 = scmp.ne.s32.totalorder %s1286_s9, %s943_s12  ;;  %s948_s26 = sshll.u32 %s1125_s25, 4  ;;  %s949_s26 = int_to_ptr.vmem [resolvable:$false] %s948_s26 }
  0x52   : > { %s950_s23 = scalar_lea.vmem %s949_s26, 512  ;;  %p951_p8 = scmp.lt.s32.totalorder %s1286_s9, %s949_s26 }
  0x53   : > { %p946_p11 = pnand %p944_p6, %p1294_p12  ;;  %p952_p2 = scmp.lt.s32.totalorder %s950_s23, %s943_s12 }
  0x55   : > { %p947_p13 = pneg %p946_p11  ;;  %p953_p3 = por %p952_p2, %p951_p8 }
  0x57   : > { %p954_p7 = pnand %p953_p3, %p947_p13 }
  0x59   : > { %957 = shalt.err (!%p954_p7)
}
  0x5a   : > { %s1545_s17 = smov 128   ;;  %s1546_s15 = sshll.u32 %s1120_s21, 8 }
  0x5b   : > { %840 = dma.hbm_to_vmem [thread:$0]  (!%p1271_p5), %s1282_s27, 256, %s1286_s9, %s1288_s14, %s1545_s17, %s1545_s17, %s1124_s13  }
  0x5c   : > { %s1326_s12 = scalar_lea.hbm %s1500_s2, %s1546_s15  ;;  %s1547_s26 = sshll.u32 %s1239_s11, 4 }
  0x5d   : > { %s261_s23 = scalar_lea.vmem [#allocation7], %s1547_s26  ;;  %s1126_s3 = smov [#allocation10]  }
  0x5e   : > { %s268_s1 = sshll.u32 %s261_s23, 4  ;;  %s201_s20 = sshll.u32 %s1126_s3, 4  ;;  %s1330_s1 = int_to_ptr.vmem [resolvable:$true] %s268_s1  ;;  %s202_s20 = int_to_ptr.vmem [resolvable:$true] %s201_s20 }
  0x5f   : > { %s728_s24 = sshll.u32 %s1239_s11, 5  ;;  %s958_s5 = scalar_lea.hbm %s1502_s4, 256 }
  0x60   : > { %p959_p2 = scmp.ne.s32.totalorder %s1502_s4, %s958_s5  ;;  %p1548_p8 = scmp.ne.s32.totalorder %s1538_s10, 0 }
  0x61   : > { %p965_p1 = scmp.lt.u32.totalorder %s958_s5, %s1502_s4 }
  0x62   : > { %p1549_p0 = pneg %p1548_p8 }
  0x64   : > { %p961_p9 = pnand %p959_p2, %p1549_p0 }
  0x66   : > { %p962_p10 = pneg %p961_p9 }
  0x68   : > { %p967_p4 = pnand %p965_p1, %p962_p10 }
  0x6a   : > { %970 = shalt.err (!%p967_p4)
}
  0x6b   : > { %s971_s3 = scalar_lea.vmem %s202_s20, 256  ;;  %p1550_p11 = pmov %p1549_p0 }
  0x6c   : > { %p972_p6 = scmp.ne.s32.totalorder %s202_s20, %s971_s3  ;;  %p979_p7 = scmp.lt.s32.totalorder %s202_s20, %s202_s20 }
  0x6d   : > { %p980_p5 = scmp.lt.s32.totalorder %s971_s3, %s971_s3 }
  0x6e   : > { %p974_p13 = pnand %p972_p6, %p1550_p11 }
  0x6f   : > { %p981_p12 = por %p980_p5, %p979_p7 }
  0x70   : > { %p975_p3 = pneg %p974_p13 }
  0x72   : > { %p982_p0 = pnand %p981_p12, %p975_p3 }
  0x74   : > { %985 = shalt.err (!%p982_p0)
}
  0x75   : > { %833 = dma.hbm_to_vmem [thread:$0]  (!%p1548_p8), %s1502_s4, 256, %s202_s20, [#allocation9], %s1545_s17, %s1545_s17, %s1124_s13  }
  0x76   : > { %s754_s6 = sshll.u32 %s1120_s21, 9  ;;  %s219_s10 = scalar_lea.vmem [#allocation2], %s728_s24 }
  0x77   : > { %s1360_s23 = scalar_lea.hbm %s1498_s0, %s754_s6  ;;  %s226_s27 = sshll.u32 %s219_s10, 4  ;;  %s1362_s27 = int_to_ptr.vmem [resolvable:$true] %s226_s27 }
  0x78   : > { %s216_s9 = scalar_lea.sflag [#allocation3], %s1239_s11  ;;  %s986_s15 = scalar_lea.hbm %s1360_s23, 512 }
  0x79   : > { %p987_p5 = scmp.ne.s32.totalorder %s1360_s23, %s986_s15  ;;  %p1551_p12 = scmp.ne.s32.totalorder %s1544_s8, 0 }
  0x7a   : > { %s991_s3 = scalar_lea.hbm %s1498_s0, 1024  ;;  %p992_p9 = scmp.lt.u32.totalorder %s1360_s23, %s1498_s0 }
  0x7b   : > { %p989_p2 = pnand %p987_p5, %p1551_p12  ;;  %p993_p10 = scmp.lt.u32.totalorder %s991_s3, %s986_s15 }
  0x7c   : > { %p995_p4 = scmp.lt.u32.totalorder %s986_s15, %s1360_s23 }
  0x7d   : > { %p990_p8 = pneg %p989_p2  ;;  %p994_p1 = por %p993_p10, %p992_p9 }
  0x7f   : > { %p996_p6 = por %p995_p4, %p994_p1 }
  0x81   : > { %p997_p11 = pnand %p996_p6, %p990_p8 }
  0x83   : > { %1000 = shalt.err (!%p997_p11)
}
  0x84   : > { %s1001_s24 = scalar_lea.vmem %s1362_s27, 512  ;;  %s1127_s6 = smov [#allocation2]  }
  0x85   : > { %p1002_p13 = scmp.ne.s32.totalorder %s1362_s27, %s1001_s24  ;;  %s1006_s25 = sshll.u32 %s1127_s6, 4  ;;  %s1007_s25 = int_to_ptr.vmem [resolvable:$false] %s1006_s25 }
  0x86   : > { %s1008_s26 = scalar_lea.vmem %s1007_s25, 1024  ;;  %p1009_p0 = scmp.lt.s32.totalorder %s1362_s27, %s1007_s25 }
  0x87   : > { %p1004_p3 = pnand %p1002_p13, %p1551_p12  ;;  %p1010_p5 = scmp.lt.s32.totalorder %s1008_s26, %s1001_s24 }
  0x89   : > { %p1005_p7 = pneg %p1004_p3  ;;  %p1011_p2 = por %p1010_p5, %p1009_p0 }
  0x8b   : > { %p1012_p9 = pnand %p1011_p2, %p1005_p7 }
  0x8d   : > { %1015 = shalt.err (!%p1012_p9)
}
  0x8e   : > { %p1552_p8 = scmp.ne.s32.totalorder %s1542_s16, 0  ;;  %s1016_s10 = scalar_lea.hbm %s1326_s12, 256 }
  0x8f   : > { %p1017_p10 = scmp.ne.s32.totalorder %s1326_s12, %s1016_s10  ;;  %s1021_s28 = scalar_lea.hbm %s1500_s2, 512 }
  0x90   : > { %837 = dma.hbm_to_vmem [thread:$0]  (!%p1552_p8), %s1360_s23, 512, %s1362_s27, %s216_s9, %s1545_s17, %s1545_s17, %s1124_s13  }
  0x91   : > { %p1019_p1 = pnand %p1017_p10, %p1551_p12  ;;  %p1022_p6 = scmp.lt.u32.totalorder %s1326_s12, %s1500_s2 }
  0x92   : > { %p1023_p11 = scmp.lt.u32.totalorder %s1021_s28, %s1016_s10  ;;  %p1025_p3 = scmp.lt.u32.totalorder %s1016_s10, %s1326_s12 }
  0x93   : > { %p1020_p4 = pneg %p1019_p1 }
  0x94   : > { %p1024_p13 = por %p1023_p11, %p1022_p6 }
  0x96   : > { %p1026_p7 = por %p1025_p3, %p1024_p13 }
  0x98   : > { %p1027_p0 = pnand %p1026_p7, %p1020_p4 }
  0x9a   : > { %1030 = shalt.err (!%p1027_p0)
}
  0x9b   : > { %s1031_s11 = scalar_lea.vmem %s1330_s1, 256  ;;  %s1128_s23 = smov [#allocation7]  }
  0x9c   : > { %p1032_p5 = scmp.ne.s32.totalorder %s1330_s1, %s1031_s11  ;;  %s1036_s27 = sshll.u32 %s1128_s23, 4  ;;  %s1037_s27 = int_to_ptr.vmem [resolvable:$false] %s1036_s27 }
  0x9d   : > { %s1038_s9 = scalar_lea.vmem %s1037_s27, 512  ;;  %p1039_p10 = scmp.lt.s32.totalorder %s1330_s1, %s1037_s27 }
  0x9e   : > { %p1034_p2 = pnand %p1032_p5, %p1551_p12  ;;  %p1040_p1 = scmp.lt.s32.totalorder %s1038_s9, %s1031_s11 }
  0xa0   : > { %p1035_p9 = pneg %p1034_p2  ;;  %p1041_p6 = por %p1040_p1, %p1039_p10 }
  0xa2   : > { %p1042_p11 = pnand %p1041_p6, %p1035_p9 }
  0xa4   : > { %1045 = shalt.err (!%p1042_p11)
}
  0xa5   : > { %843 = dma.hbm_to_vmem [thread:$0]  (!%p1552_p8), %s1326_s12, 256, %s1330_s1, %s1288_s14, %s1545_s17, %s1545_s17, %s1124_s13  }
  0xa6   : > { %p1553_p12 = scmp.ne.s32.totalorder %s1537_s7, 0 }
  0xa7   : > { %s1419_s8 = sand.u32 (!%p1553_p12), 1, %s1112_s19   ;;  %p1554_p4 = scmp.ne.s32.totalorder (!%p1553_p12), %s1533_s29, 0 }
  0xa8   : > { %280 = sbr.rel (%p1553_p12) target bundleno = 724 (0x2d4), region = 40  ;;  %s738_s18 = sshll.u32 (!%p1553_p12), %s1419_s8, 5 }
  0xa9   : > { %s283_s24 = scalar_lea.sflag (!%p1553_p12), [#allocation3], %s1419_s8  ;;  %s286_s6 = scalar_lea.vmem (!%p1553_p12), [#allocation2], %s738_s18 }
  0xaf   : > { %1091 = dma.done.wait (%p1554_p4), %s283_s24, 512  }
  0xb0   : > { %1093 = vsyncadd (%p1554_p4), %s283_s24, 4294966784  ;;  %s291_s1 = sand.u32 1, %s1185_s22   ;;  %s1429_s7 = sshll.u32 %s1419_s8, 4 }
  0xb1   : > { %s292_s13 = scalar_lea.sflag [#allocation6], %s291_s1  ;;  %s295_s16 = scalar_lea.vmem [#allocation5], %s1429_s7 }
  0xb2   : > { %1095 = dma.done.wait (%p1554_p4), %s292_s13, 512  }
  0xb3   : > { %1097 = vsyncadd (%p1554_p4), %s292_s13, 4294966784  ;;  %s304_s14 = scalar_lea.vmem [#allocation7], %s1429_s7  ;;  %p1555_p8 = scmp.eq.s32.totalorder %s1185_s22, 0 }
  0xb5   : > { %1099 = dma.done.wait (%p1555_p8), [#allocation9], 512   ;;  %p1556_p13 = pmov %p1555_p8 }
  0xb6   : > { %vm355_vm0 = vcmask 523264   ;;  %v353_v0 = vld [vmem:[%s286_s6 + $0x10] sm:$0xff]  ;;  %v351_v1 = vld [vmem:[%s286_s6] sm:$0xff]  ;;  %v354_v2 = vld [vmem:[%s286_s6 + $0x18] sm:$0xff]  ;;  %vm374_vm1 = vcmask 400384   ;;  %vm472_vm2 = vcmask 130048  }
  0xb7   : > { %1101 = vsyncadd (%p1556_p13), [#allocation9], 4294966784  ;;  %v362_v3 = vsel %vm355_vm0, %v353_v0, -inf  ;;  %v356_v4 = vsel %vm355_vm0, %v351_v1, -inf  ;;  %v352_v5 = vld [vmem:[%s286_s6 + $0x8] sm:$0xff]  ;;  %v365_v6 = vsel %vm355_vm0, %v354_v2, -inf }
  0xb8   : > { %363 = vmax.xlane.f32.xlu1 %v362_v3  ;;  %357 = vmax.xlane.f32.xlu0 %v356_v4  ;;  %v359_v7 = vsel %vm355_vm0, %v352_v5, -inf  ;;  %v350_v8 = vld [vmem:[%s295_s16 + $0x8] sm:$0xff]  ;;  %v349_v9 = vld [vmem:[%s295_s16] sm:$0xff]  ;;  %v1129_v13 = vmov 0   ;;  %vm381_vm3 = vcmask 1040384   ;;  %v1130_v24 = vmov 1.0  }
  0xb9   : > { %v372_v10 = vld [vmem:[#allocation8] sm:$0xff]  ;;  %v807_v11 = vpack.c.bf16 %v350_v8, %v349_v9  ;;  %v460_v12 = vld [vmem:[#allocation10] sm:$0xff]  ;;  %895 = vset.pattern.permute.xlu1 %v1129_v13  ;;  %894 = vset.pattern.permute.xlu0 %v1129_v13  ;;  %v461_v14 = vld [vmem:[#allocation10 + $0x8] sm:$0xff]  ;;  %s757_s29 = sshll.u32 %s1185_s22, 8  ;;  %s348_s17 = scalar_lea.vmem [#allocation11], %s1429_s7 }
  0xba   : > { %785 = vmatprep.mubr.msk.f32.mxu0 %vm374_vm1, %v372_v10  ;;  %792 = vmatprep.mubr.msk.f32.mxu1 %vm472_vm2, %v460_v12  ;;  %v373_v25 = vld [vmem:[#allocation8 + $0x8] sm:$0xff]  ;;  %s588_s12 = sshll.u32 %s348_s17, 4  ;;  %v568_v42 = vld [vmem:[%s304_s14] sm:$0xff]  ;;  %s1557_s10 = sld [smem:[#allocation23_spill]]  ;;  %s1454_s12 = int_to_ptr.vmem [resolvable:$true] %s588_s12 }
  0xbb   : > { %808 = vmatprep.subr.bf16.mxu1 %v807_v11  ;;  %v569_v40 = vld [vmem:[%s304_s14 + $0x8] sm:$0xff]  ;;  %s575_s22 = scalar_lea.sflag [#allocation4], %s1419_s8  ;;  %s1046_s20 = scalar_lea.vmem %s1454_s12, 256 }
  0xbc   : > { %366 = vmax.xlane.f32.xlu1 %v365_v6  ;;  %360 = vmax.xlane.f32.xlu0 %v359_v7  ;;  %p1047_p3 = scmp.ne.s32.totalorder %s1454_s12, %s1046_s20  ;;  %p1558_p7 = scmp.ne.s32.totalorder %s1534_s30, 0 }
  0xbd   : > { %810 = vmatpush3.bf16.msra.mxu1 %v807_v11  ;;  %s1131_s28 = smov [#allocation11]  }
  0xbe   : > { %p1048_p0 = pnand %p1047_p3, %p1558_p7  ;;  %s1050_s3 = sshll.u32 %s1131_s28, 4  ;;  %s1051_s3 = int_to_ptr.vmem [resolvable:$false] %s1050_s3 }
  0xbf   : > { %s1052_s5 = scalar_lea.vmem %s1051_s3, 512  ;;  %p1053_p2 = scmp.lt.s32.totalorder %s1454_s12, %s1051_s3 }
  0xc0   : > { %370 = vmax.xlane.f32.xlu1 %v350_v8  ;;  %368 = vmax.xlane.f32.xlu0 %v349_v9  ;;  %s1452_s15 = scalar_lea.hbm %s1557_s10, %s757_s29  ;;  %p1049_p5 = pneg %p1048_p0 }
  0xc1   : > { %793 = vmatmul.mubr.msk.f32.vlgmr.msra.gmra.mrb[0].mxu1 %vm472_vm2, %v461_v14  ;;  %p1054_p9 = scmp.lt.s32.totalorder %s1052_s5, %s1046_s20 }
  0xc3   : > { %p1055_p10 = por %p1054_p9, %p1053_p2 }
  0xc5   : > { %p1056_p1 = pnand %p1055_p10, %p1049_p5 }
 0x145   : > { %v364_v15 = vpop.xlane.xlu1 %363  ;;  %v358_v16 = vpop.xlane.xlu0 %357 }
 0x149   : > { %v367_v17 = vpop.xlane.xlu1 %366  ;;  %v361_v18 = vpop.xlane.xlu0 %360 }
 0x14a   : > { %v795_v19 = vpack.c.bf16 %v361_v18, %v358_v16  ;;  %v799_v20 = vpack.c.bf16 %v367_v17, %v364_v15 }
 0x14c   : > { %796 = vmatprep.subr.bf16.mxu0 %v795_v19 }
 0x14d   : > { %798 = vmatpush3.bf16.msra.mxu0 %v795_v19  ;;  %v371_v21 = vpop.xlane.xlu1 %370  ;;  %v369_v22 = vpop.xlane.xlu0 %368 }
 0x14e   : > { %800 = vmatprep.subr.bf16.mxu0 %v799_v20  ;;  %v803_v23 = vpack.c.bf16 %v371_v21, %v369_v22 }
 0x151   : > { %802 = vmatpush3.bf16.msra.mxu0 %v799_v20 }
 0x152   : > { %804 = vmatprep.subr.bf16.mxu0 %v803_v23 }
 0x155   : > { %806 = vmatpush3.bf16.msra.mxu0 %v803_v23 }
 0x156   : > { %783 = vmatprep.subr.msk.mxu0 %vm381_vm3, %v1130_v24 }
 0x159   : > { %784 = vmatpush3.msk.msra.mxu0 %vm381_vm3, %v1130_v24 }
 0x15a   : > { %786 = vmatmul.mubr.msk.f32.vlgmr.msra.gmra.mrb[0].mxu0 %vm374_vm1, %v373_v25 }
 0x194   : > { %v794_v26 = vpop.f32.mrb[0].mxu1 }
 0x195   : > { %v545_v28 = vpop.f32.mrb[1].mxu1 }
 0x22d   : > { %v787_v27 = vpop.f32.mrb[0].mxu0 }
 0x22e   : > { %469 = vperm.xlu1 %895, %v787_v27   ;;  %v451_v29 = vpop.f32.mrb[1].mxu0 }
 0x22f   : > { %464 = vperm.xlu0 %894, %v451_v29  }
 0x2ad   : > { %v470_v30 = vpop.permute.xlu1 %469 }
 0x2ae   : > { %v551_v31 = vadd.f32 %v794_v26, %v470_v30  ;;  %v465_v32 = vpop.permute.xlu0 %464 }
 0x2af   : > { %v546_v33 = vadd.f32 %v545_v28, %v465_v32 }
 0x2b0   : > { %v555_v34 = vand.u32 2147483647, %v551_v31 }
 0x2b1   : > { %v554_v35 = vand.u32 2147483647, %v546_v33 }
 0x2b2   : > { %v557_v36 = vadd.f32 1.0, %v555_v34  ;;  %vm565_vm4 = vcmp.eq.f32.partialorder %v555_v34, inf }
 0x2b3   : > { %v556_v37 = vadd.f32 1.0, %v554_v35  ;;  %vm564_vm5 = vcmp.eq.f32.partialorder %v554_v35, inf }
 0x2b4   : > { %896 = vrcp.f32 %v557_v36 }
 0x2b5   : > { %898 = vrcp.f32 %v556_v37 }
 0x2be   : > { %v897_v38 = vpop.eup %896 }
 0x2bf   : > { %v899_v39 = vpop.eup %898  ;;  %v561_v41 = vmul.f32 %v897_v38, %v555_v34 }
 0x2c0   : > { %v559_v43 = vmul.f32 %v899_v39, %v554_v35 }
 0x2c1   : > { %v567_v44 = vsel %vm565_vm4, 1.0, %v561_v41 }
 0x2c2   : > { %v571_v45 = vmul.f32 %v569_v40, %v567_v44  ;;  %v566_v46 = vsel %vm564_vm5, 1.0, %v559_v43 }
 0x2c3   : > { %v570_v47 = vmul.f32 %v568_v42, %v566_v46 }
 0x2c4   : > { %573 = vst [vmem:[%s348_s17 + $0x8] sm:$0xff] %v571_v45 }
 0x2c5   : > { %572 = vst [vmem:[%s348_s17] sm:$0xff] %v570_v47 }
 0x2c6   : > { %1059 = shalt.err (!%p1056_p1)
}
 0x2c7   : > { %s1060_s11 = scalar_lea.hbm %s1452_s15, 256  ;;  %s1064_s9 = scalar_lea.hbm %s1557_s10, 512 }
 0x2c8   : > { %p1061_p6 = scmp.ne.s32.totalorder %s1452_s15, %s1060_s11  ;;  %p1065_p4 = scmp.lt.u32.totalorder %s1452_s15, %s1557_s10 }
 0x2c9   : > { %p1066_p8 = scmp.lt.u32.totalorder %s1064_s9, %s1060_s11  ;;  %p1068_p3 = scmp.lt.u32.totalorder %s1060_s11, %s1452_s15 }
 0x2ca   : > { %p1062_p11 = pnand %p1061_p6, %p1558_p7 }
 0x2cb   : > { %p1067_p13 = por %p1066_p8, %p1065_p4 }
 0x2cc   : > { %p1063_p12 = pneg %p1062_p11 }
 0x2cd   : > { %p1069_p0 = por %p1068_p3, %p1067_p13 }
 0x2cf   : > { %p1070_p5 = pnand %p1069_p0, %p1063_p12 }
 0x2d1   : > { %1073 = shalt.err (!%p1070_p5)
}
 0x2d2   : > { %s1132_s6 = smov 128   ;;  %s1133_s1 = smov 8  }
 0x2d3   : > { %825 = dma.vmem_to_hbm [thread:$0]  (%p1558_p7), %s1454_s12, 256, %s1452_s15, %s575_s22, %s1132_s6, %s1132_s6, %s1133_s1  }
 0x2d4 PF: > { %s1559_s7 = sld [smem:[#allocation16_spill]]  ;;  %s1560_s13 = sld [smem:[#allocation20_spill]] }
 0x2d5   : > { %p1562_p9 = scmp.ge.s32.totalorder %s1120_s21, 2 }
 0x2da   : > { %s603_s16 = sand.u32 1, %s1559_s7   ;;  %p1561_p2 = scmp.ne.s32.totalorder %s1560_s13, 0 }
 0x2db   : > { %s604_s14 = scalar_lea.sflag [#allocation4], %s603_s16 }
 0x2dc   : > { %p845_p10 = pnand %p1562_p9, %p1561_p2 }
 0x2de   : > { %1103 = dma.done.wait (!%p845_p10), %s604_s14, 256  }
 0x2df   : > { %1105 = vsyncadd (!%p845_p10), %s604_s14, 4294967040  ;;  %s1563_s21 = sld [smem:[#allocation18_spill]]  ;;  %s1564_s29 = sld [smem:[#allocation17_spill]] }
 0x2e0   : > { %s1565_s20 = sld [smem:[#allocation19_spill]]  ;;  %s1566_s18 = smov %s1112_s19 }
 0x2e5   : > { %p22_p1 = scmp.ge.s32.totalorder %s1563_s21, 4   ;;  %s1567_s19 = smov %s1564_s29 }
 0x2e7   :  { %24 = sbr.rel (!%p22_p1) target bundleno = 12 (0xc), region = 117 }
 0x2ee   :  { %609 = vsyncpa [#allocation3], 1 }
 0x2ef   :  { %611 = vsyncpa [#allocation3 + $0x1], 1 }
 0x2f0   :  { %612 = vsyncpa [#allocation6], 1 }
 0x2f1   :  { %614 = vsyncpa [#allocation6 + $0x1], 1 }
 0x2f2   :  { %615 = vsyncpa [#allocation9], 1 }
 0x2f3   :  { %616 = vsyncpa [#allocation4], 1 }
 0x2f4   :  { %618 = vsyncpa [#allocation4 + $0x1], 1 }

</bundles_post_ra>
